<compile_context>
chip_gen: v6e
topology: v6e:2x2x1
jax: 0.10.0
libtpu: 0.0.40
codegen_flags: <defaults>
</compile_context>

<pallas_src>
import functools

import jax
import jax.numpy as jnp
from jax.experimental import pallas as pl
from jax.experimental.pallas import tpu as pltpu


def _copy_kernel(x_ref, o_ref):
    # Identity on the whole VMEM tile (lane-dense, unmasked stores).
    o_ref[...] = x_ref[...]


def _choose_slab(total: int):
    """Pick a lane-dense (rows, lanes) slab for `total` elements.

    Prefers a lane width (multiple of 128, up to 2048) that divides `total`
    with rows a multiple of 8 so no padding is needed; otherwise pads up.
    Returns (lanes, rows, pad_elems).
    """
    for lanes in (2048, 1024, 512, 256, 128):
        if total % lanes == 0 and (total // lanes) % 8 == 0:
            return lanes, total // lanes, 0
    lanes = 512
    rows = -(-total // lanes)          # ceil div
    rows = -(-rows // 8) * 8           # round rows up to multiple of 8
    return lanes, rows, rows * lanes - total


@functools.partial(jax.jit, static_argnames=("num_classes",))
def unet_forward(x: jax.Array, num_classes: int = 3) -> jax.Array:
    """Pallas equivalent of UNet(num_classes).forward(x): identity pass-through."""
    del num_classes  # unused by the reference forward (stub module)

    orig_shape = x.shape
    total = x.size
    itemsize = jnp.dtype(x.dtype).itemsize

    lanes, rows, pad = _choose_slab(total)

    flat = x.reshape(-1)
    if pad:
        flat = jnp.pad(flat, (0, pad))
    x2d = flat.reshape(rows, lanes)

    # Block sizing: each block <= ~4 MiB so the multi-buffered input (up to 3
    # windows) plus double-buffered output windows (~20 MiB total) fit within
    # the 48 MiB scoped-VMEM budget below (and v7x's 64 MiB physical VMEM),
    # while staying wide (>= 128 lanes) and sublane-aligned (>= 8 rows) for
    # unmasked vld/vst.
    target_block_bytes = 4 * 1024 * 1024
    max_rows = max(8, (target_block_bytes // (lanes * itemsize)) // 8 * 8)
    row_tile = min(rows, max_rows)
    while rows % row_tile:
        row_tile -= 8                  # rows is a multiple of 8 -> terminates
    grid = (rows // row_tile,)

    # Triple-buffer the input window only when there are enough grid steps for
    # the extra prefetch depth to matter; default double-buffering otherwise.
    in_pipeline_mode = pl.Buffered(3) if grid[0] >= 3 else None

    out2d = pl.pallas_call(
        _copy_kernel,
        out_shape=jax.ShapeDtypeStruct(x2d.shape, x2d.dtype),
        grid=grid,
        in_specs=[
            pl.BlockSpec(
                (row_tile, lanes),
                lambda i: (i, 0),
                pipeline_mode=in_pipeline_mode,
            )
        ],
        out_specs=pl.BlockSpec((row_tile, lanes), lambda i: (i, 0)),
        # Alias input -> output: the identity needs no second HBM buffer.
        input_output_aliases={0: 0},
        compiler_params=pltpu.CompilerParams(
            # 'parallel' lets v7x shard the copy across its 2 TensorCores;
            # harmless (single-TC sequential loop) on v5e/v6e.
            dimension_semantics=("parallel",),
            # Explicit scoped-VMEM budget: within v7x's 64 MiB physical VMEM,
            # above the 16/32 MiB defaults on v5e/v6e for larger tiles.
            vmem_limit_bytes=48 * 1024 * 1024,
        ),
    )(x2d)

    out = out2d.reshape(-1)
    if pad:
        out = out[:total]
    return out.reshape(orig_shape)


if __name__ == "__main__":
    key = jax.random.PRNGKey(0)
    # Small NCHW input consistent with an image-segmentation forward pass.
    x = jax.random.normal(key, (2, 4, 16, 16), dtype=jnp.float32)

    y = unet_forward(x, num_classes=3)
    y = jax.block_until_ready(y)

    assert y.shape == x.shape, (y.shape, x.shape)
    assert y.dtype == x.dtype
    assert bool(jnp.allclose(y, x)), "pass-through mismatch"

    print("KERNEL_OK")
</pallas_src>

<mosaic_0001>
module attributes {stable_mosaic.version = 11 : i64} {
  func.func @_copy_kernel(%arg0: i32, %arg1: memref<8x256xf32, #tpu.memory_space<vmem>>, %arg2: memref<8x256xf32, #tpu.memory_space<vmem>>) attributes {dimension_semantics = [#tpu.dimension_semantics<parallel>], iteration_bounds = array<i64: 1>, scalar_prefetch = 0 : i64, scratch_operands = 0 : i64, tpu.core_type = #tpu.core_type<tc>, window_params = [{transform_indices = @transform_0, window_bounds = array<i64: 8, 256>}, {transform_indices = @transform_1, window_bounds = array<i64: 8, 256>}]} {
    %c0 = arith.constant 0 : index
    %c0_0 = arith.constant 0 : index
    %0 = vector.load %arg1[%c0, %c0_0] : memref<8x256xf32, #tpu.memory_space<vmem>>, vector<8x256xf32>
    %c0_1 = arith.constant 0 : index
    %c0_2 = arith.constant 0 : index
    %1 = vector.load %arg2[%c0_1, %c0_2] : memref<8x256xf32, #tpu.memory_space<vmem>>, vector<8x256xf32>
    tpu.vector_store %arg2[%c0_1, %c0_2], %0 {strides = array<i32>} : memref<8x256xf32, #tpu.memory_space<vmem>>, vector<8x256xf32>,
    return
  }
  func.func @transform_0(%arg0: i32) -> (i32, i32) {
    %c0_i32 = arith.constant 0 : i32
    %c0_i32_0 = arith.constant 0 : i32
    return %arg0, %c0_i32 : i32, i32
  }
  func.func @transform_1(%arg0: i32) -> (i32, i32) {
    %c0_i32 = arith.constant 0 : i32
    %c0_i32_0 = arith.constant 0 : i32
    return %arg0, %c0_i32 : i32, i32
  }
}

</mosaic_0001>

<bundles_post_ra>
// kernel: unet_forward.1
= control target key start
LH: loop header
LB: loop body
LE: loop exit
PB: predicated region body
PF: predicated region fallthrough
CT: control target
= control target key end

     0   :  { %s38_s0 = inlined_call_operand.vmem [shape: f32[8,256], index: 0, kind: input, shape index: {}, may-alias: {0,1}]   ;;  %s39_s1 = inlined_call_operand.vmem [shape: f32[8,256], index: 1, kind: output, shape index: {}, may-alias: {0,1}]  }
   0x1   :  { %v8_v0 = vld [vmem:[%s38_s0] sm:$0xff]  ;;  %v9_v1 = vld [vmem:[%s38_s0 + $0x8] sm:$0xff] }
   0x2   :  { %10 = vst [vmem:[%s39_s1] sm:$0xff] %v8_v0  ;;  %11 = vst [vmem:[%s39_s1 + $0x8] sm:$0xff] %v9_v1 }

</bundles_post_ra>
